<compile_context>
chip_gen: v6e
topology: v6e:2x2x1
jax: 0.10.0
libtpu: 0.0.40
codegen_flags: <defaults>
</compile_context>

<pallas_src>
import functools

import jax
import jax.numpy as jnp
from jax import lax
from jax.experimental import pallas as pl
from jax.experimental.pallas import tpu as pltpu


def _round_up(x, m):
    return (x + m - 1) // m * m


def _cdiv(a, b):
    return (a + b - 1) // b


def _im2col_nchw(x, patch_size, stride):
    """(B, C, H, W) -> ((B*num_patches, C*ph*pw), oh, ow).

    Feature ordering is (C, kh, kw), identical to PyTorch's Conv2d weight
    flattening (E, C, ph, pw) -> (E, C*ph*pw).
    """
    ph, pw = patch_size
    sh, sw = stride
    B, C, H, W = x.shape
    oh = (H - ph) // sh + 1
    ow = (W - pw) // sw + 1

    if (sh, sw) == (ph, pw) and H % ph == 0 and W % pw == 0:
        # Non-overlapping patches: pure reshape/transpose, no gather.
        p = x.reshape(B, C, oh, ph, ow, pw).transpose(0, 2, 4, 1, 3, 5)
        return p.reshape(B * oh * ow, C * ph * pw), oh, ow

    # Overlapping strides: strided patch extraction via an identity-kernel conv
    # (fast XLA conv; NHWC output so the (M, K) reshape below is a free view).
    # Output channel ordering of conv_general_dilated_patches is (c, kh, kw),
    # matching the PyTorch weight flattening used in patch_embed_new().
    p = lax.conv_general_dilated_patches(
        x, filter_shape=(ph, pw), window_strides=(sh, sw), padding="VALID",
        dimension_numbers=("NCHW", "OIHW", "NHWC"))      # (B, oh, ow, C*ph*pw)
    return p.reshape(B * oh * ow, C * ph * pw), oh, ow


def _patch_embed_kernel(p_ref, w_ref, b_ref, o_ref, *, precision):
    # p_ref: (tm, K)  patch rows for this M tile (compute dtype, e.g. bf16)
    # w_ref: (K, Ep)  projection weight (resident: constant index_map)
    # b_ref: (1, Ep)  bias row (f32)
    # o_ref: (tm, Ep)
    acc = jnp.dot(p_ref[...], w_ref[...],
                  preferred_element_type=jnp.float32, precision=precision)
    o_ref[...] = (acc + b_ref[...]).astype(o_ref.dtype)


def patch_embed_new(x, weight, bias, patch_size, stride, *,
                    tile_m=512, compute_dtype=jnp.bfloat16, out_dtype=None,
                    vmem_budget_bytes=32 * 1024 * 1024):
    """Forward pass of PatchEmbed_new.

    x:      (B, C, H, W)   NCHW
    weight: (E, C, ph, pw) PyTorch Conv2d weight layout
    bias:   (E,)
    returns (B, num_patches, E)
    """
    ph, pw = patch_size
    B, C, H, W = x.shape
    E = weight.shape[0]
    K = C * ph * pw
    cdt = jnp.dtype(compute_dtype)
    odt = jnp.dtype(x.dtype if out_dtype is None else out_dtype)

    # Cast once up front so im2col already streams / materializes the narrow
    # dtype (exact for the identity-kernel patch conv and the reshape path).
    p_mat, oh, ow = _im2col_nchw(x.astype(cdt), patch_size, stride)    # (M, K)
    M = p_mat.shape[0]
    N = oh * ow

    # Only E is padded (lane-dense output stores).  K stays unpadded; M unpadded.
    Ep = _round_up(E, 128)

    w_mat = weight.reshape(E, K).T.astype(cdt)                         # (K, E)
    if Ep != E:
        w_mat = jnp.pad(w_mat, ((0, 0), (0, Ep - E)))
    b_row = bias.astype(jnp.float32).reshape(1, E)
    if Ep != E:
        b_row = jnp.pad(b_row, ((0, 0), (0, Ep - E)))

    # ---- M-tile selection: >=2 tiles when possible (v7x megacore), VMEM-capped.
    in_sz, w_sz, out_sz = cdt.itemsize, cdt.itemsize, odt.itemsize

    def vmem_est(tm):
        return (2 * tm * K * in_sz          # patch tile, double-buffered
                + 2 * tm * Ep * out_sz      # output tile, double-buffered
                + 2 * K * Ep * w_sz         # resident weight (worst case 2 bufs)
                + 2 * Ep * 4)               # bias

    if M <= 8:
        tm = M                                       # single full-extent tile
    else:
        if tile_m >= M:
            tm = _round_up(_cdiv(M, 2), 8)           # split -> >=2 grid steps
        else:
            tm = _round_up(tile_m, 8)
        while tm > 8 and vmem_est(tm) > vmem_budget_bytes:
            tm = max(8, _round_up(tm // 2, 8))
    num_m_tiles = _cdiv(M, tm)

    # Explicit scoped-VMEM limit: v5e default is 16 MiB; cap at v7x's 64 MiB.
    vmem_limit = int(min(max(vmem_est(tm) + (8 << 20), 32 << 20), 64 << 20))

    cost = pl.CostEstimate(
        flops=2 * M * K * Ep,
        transcendentals=0,
        bytes_accessed=M * K * in_sz + K * Ep * w_sz + M * Ep * out_sz,
    )

    kernel = functools.partial(
        _patch_embed_kernel,
        precision=(lax.Precision.HIGHEST if cdt == jnp.dtype(jnp.float32)
                   else lax.Precision.DEFAULT))

    out = pl.pallas_call(
        kernel,
        out_shape=jax.ShapeDtypeStruct((M, Ep), odt),
        grid_spec=pltpu.PrefetchScalarGridSpec(
            num_scalar_prefetch=0,
            grid=(num_m_tiles,),
            in_specs=[
                pl.BlockSpec((tm, K), lambda i: (i, 0)),
                pl.BlockSpec((K, Ep), lambda i: (0, 0)),   # weight: fetched once
                pl.BlockSpec((1, Ep), lambda i: (0, 0)),   # bias:   fetched once
            ],
            out_specs=pl.BlockSpec((tm, Ep), lambda i: (i, 0)),
        ),
        compiler_params=pltpu.CompilerParams(
            dimension_semantics=("parallel",),
            vmem_limit_bytes=vmem_limit,
        ),
        cost_estimate=cost,
    )(p_mat, w_mat, b_row)

    if Ep != E:
        out = out[:, :E]
    return out.reshape(B, N, E)


def _reference_forward(x, weight, bias, stride):
    """Pure-JAX f32 reference: NCHW conv + flatten(2).transpose(1,2)."""
    y = lax.conv_general_dilated(
        x, weight, window_strides=stride, padding="VALID",
        dimension_numbers=("NCHW", "OIHW", "NCHW"))
    y = y + bias[None, :, None, None]
    B, E, h, w = y.shape
    return y.reshape(B, E, h * w).transpose(0, 2, 1)


if __name__ == "__main__":
    # Small shapes consistent with the module's forward:
    # img_size=16, patch_size=4, stride=2 (overlapping), in_chans=4, embed_dim=32
    B, C, H, W = 2, 4, 16, 16
    patch_size = (4, 4)
    stride = (2, 2)
    embed_dim = 32

    key = jax.random.PRNGKey(0)
    kx, kw, kb = jax.random.split(key, 3)
    x = jax.random.normal(kx, (B, C, H, W), dtype=jnp.float32)
    # Deterministic synthetic Conv2d parameters (PyTorch layout: (E, C, ph, pw)).
    fan_in = C * patch_size[0] * patch_size[1]
    bound = 1.0 / jnp.sqrt(fan_in)
    weight = jax.random.uniform(kw, (embed_dim, C, *patch_size),
                                minval=-bound, maxval=bound, dtype=jnp.float32)
    bias = jax.random.uniform(kb, (embed_dim,),
                              minval=-bound, maxval=bound, dtype=jnp.float32)

    # Jit the full wrapper so the bf16 cast / im2col / (tiny) pads fuse with the
    # pallas_call instead of running as separate HBM round trips.
    fwd = jax.jit(functools.partial(patch_embed_new,
                                    patch_size=patch_size, stride=stride))
    out = jax.block_until_ready(fwd(x, weight, bias))

    ref = _reference_forward(x, weight, bias, stride)
    oh = (H - patch_size[0]) // stride[0] + 1
    ow = (W - patch_size[1]) // stride[1] + 1
    assert out.shape == (B, oh * ow, embed_dim), out.shape
    # Tolerance reflects bf16 streamed operands with f32 accumulation.
    assert jnp.allclose(out, ref, atol=5e-2, rtol=5e-2), \
        float(jnp.max(jnp.abs(out - ref)))

    print("KERNEL_OK")
</pallas_src>

<mosaic_0001>
module attributes {stable_mosaic.version = 11 : i64} {
  func.func @_patch_embed_kernel(%arg0: i32, %arg1: memref<56x64xbf16, #tpu.memory_space<vmem>>, %arg2: memref<64x128xbf16, #tpu.memory_space<vmem>>, %arg3: memref<1x128xf32, #tpu.memory_space<vmem>>, %arg4: memref<56x128xf32, #tpu.memory_space<vmem>>) attributes {dimension_semantics = [#tpu.dimension_semantics<parallel>], iteration_bounds = array<i64: 2>, scalar_prefetch = 0 : i64, scratch_operands = 0 : i64, tpu.core_type = #tpu.core_type<tc>, window_params = [{transform_indices = @transform_0, window_bounds = array<i64: 56, 64>}, {pipeline_mode = #tpu.pipeline_mode<synchronous>, transform_indices = @transform_1, window_bounds = array<i64: 64, 128>}, {pipeline_mode = #tpu.pipeline_mode<synchronous>, transform_indices = @transform_2, window_bounds = array<i64: 1, 128>}, {transform_indices = @transform_3, window_bounds = array<i64: 56, 128>}]} {
    %c0 = arith.constant 0 : index
    %c0_0 = arith.constant 0 : index
    %0 = vector.load %arg1[%c0, %c0_0] : memref<56x64xbf16, #tpu.memory_space<vmem>>, vector<56x64xbf16>
    %c0_1 = arith.constant 0 : index
    %c0_2 = arith.constant 0 : index
    %1 = vector.load %arg2[%c0_1, %c0_2] : memref<64x128xbf16, #tpu.memory_space<vmem>>, vector<64x128xbf16>
    %cst = arith.constant dense<0.000000e+00> : vector<56x128xf32>
    %2 = tpu.matmul %0, %1, %cst {dimension_numbers = #tpu.dot_dimension_numbers<[1], [0], [0], [1], [0, 0, 1, 1], [], []>} : vector<56x64xbf16>, vector<64x128xbf16>, vector<56x128xf32> -> vector<56x128xf32>
    %c0_3 = arith.constant 0 : index
    %c0_4 = arith.constant 0 : index
    %3 = vector.load %arg3[%c0_3, %c0_4] : memref<1x128xf32, #tpu.memory_space<vmem>>, vector<1x128xf32>
    %4 = vector.broadcast %3 : vector<1x128xf32> to vector<56x128xf32>
    %5 = arith.addf %2, %4 : vector<56x128xf32>
    %c0_5 = arith.constant 0 : index
    %c0_6 = arith.constant 0 : index
    %6 = vector.load %arg4[%c0_5, %c0_6] : memref<56x128xf32, #tpu.memory_space<vmem>>, vector<56x128xf32>
    tpu.vector_store %arg4[%c0_5, %c0_6], %5 {strides = array<i32>} : memref<56x128xf32, #tpu.memory_space<vmem>>, vector<56x128xf32>,
    return
  }
  func.func @transform_0(%arg0: i32) -> (i32, i32) {
    %c0_i32 = arith.constant 0 : i32
    %c0_i32_0 = arith.constant 0 : i32
    return %arg0, %c0_i32 : i32, i32
  }
  func.func @transform_1(%arg0: i32) -> (i32, i32) {
    %c0_i32 = arith.constant 0 : i32
    %c0_i32_0 = arith.constant 0 : i32
    %c0_i32_1 = arith.constant 0 : i32
    return %c0_i32, %c0_i32_0 : i32, i32
  }
  func.func @transform_2(%arg0: i32) -> (i32, i32) {
    %c0_i32 = arith.constant 0 : i32
    %c0_i32_0 = arith.constant 0 : i32
    %c0_i32_1 = arith.constant 0 : i32
    return %c0_i32, %c0_i32_0 : i32, i32
  }
  func.func @transform_3(%arg0: i32) -> (i32, i32) {
    %c0_i32 = arith.constant 0 : i32
    %c0_i32_0 = arith.constant 0 : i32
    return %arg0, %c0_i32 : i32, i32
  }
}

</mosaic_0001>

<bundles_post_ra>
// kernel: patch_embed_new.1
= control target key start
LH: loop header
LB: loop body
LE: loop exit
PB: predicated region body
PF: predicated region fallthrough
CT: control target
= control target key end

     0   :  { %s856_s12 = smov 0   ;;  %s858_s13 = smov 0   ;;  %s978_s0 = inlined_call_operand.vmem [shape: bf16[98,64], index: 0, kind: input, shape index: {}]   ;;  %s979_s1 = inlined_call_operand.vmem [shape: bf16[64,128], index: 1, kind: input, shape index: {}]   ;;  %s980_s2 = inlined_call_operand.vmem [shape: f32[1,128], index: 2, kind: input, shape index: {}]   ;;  %s981_s3 = inlined_call_operand.vmem [shape: f32[98,128], index: 3, kind: output, shape index: {}]  }
   0x1   :  { %s860_s14 = smov 0  }
   0x2 LB: > { %s869_s15 = sadd.s32 4294967295, %s802_s14   ;;  %s871_s16 = sadd.s32 1, %s802_s14   ;;  %s802_s14 = sphi %s860_s14, %s988_s14   ;;  %s798_s13 = sphi %s858_s13, %s987_s13   ;;  %s794_s12 = sphi %s856_s12, %s986_s12  }
   0x3   : > { %s85_s17 = ssub.s32 %s802_s14, %s871_s16  ;;  %s88_s18 = sadd.s32 1, %s798_s13 }
   0x4   : > { %p86_p0 = scmp.eq.s32.totalorder %s85_s17, 0  ;;  %p98_p1 = scmp.ne.s32.totalorder %s798_s13, %s794_s12 }
   0x5   : > { %p99_p2 = scmp.eq.s32.totalorder %s869_s15, 1  ;;  %p586_p3 = scmp.ge.s32.totalorder %s802_s14, 1 }
   0x6   : > { %s879_s19 = scalar_select %p86_p0, %s798_s13, %s88_s18  }
   0x7   : > { %p881_p4 = por %p99_p2, %p98_p1  ;;  %p146_p5 = scmp.lt.s32.totalorder %s802_s14, 3 }
   0x9   : > { %p147_p6 = pnand %p586_p3, %p146_p5 }
   0xa   : > { %s889_s23 = smul.u32 (!%p147_p6), 7, %s869_s15  ;;  %s170_s8 = sand.u32 (!%p147_p6), 1, %s794_s12  }
   0xb   : > { %150 = sbr.rel (%p147_p6) target bundleno = 288 (0x120), region = 32 }
   0xc   : > { %p178_p7 = scmp.lt.s32.totalorder (!%p147_p6), %s889_s23, 12  ;;  %s646_s9 = smul.u32 (!%p147_p6), 56, %s170_s8 }
   0xe   : > { %s913_s14 = scalar_lea.vmem (!%p147_p6), [#allocation2], %s646_s9  }
  0x10   : > { %v736_v0 = vld [vmem:[%s979_s1 + $0x18] sm:$0xff]   ;;  %v737_v1 = vld [vmem:[%s979_s1 + $0x10] sm:$0xff]   ;;  %v738_v2 = vld [vmem:[%s979_s1 + $0x8] sm:$0xff]   ;;  %s179_s28 = scalar_select %p178_p7, %s889_s23, 12  ;;  %vm257_vm0 = vcmask 523264  }
  0x11   : > { %622 = vmatprep.subr.bf16.mxu0 %v736_v0  ;;  %638 = vmatprep.subr.bf16.mxu1 %v736_v0  ;;  %v739_v3 = vld [vmem:[%s979_s1] sm:$0xff]   ;;  %s349_s12 = ssub.s32 (%p881_p4), 13, %s889_s23  ;;  %s613_s17 = smul.u32 (%p881_p4), 56, %s869_s15 }
  0x12   : > { %623 = vmatpush3.bf16.msra.mxu0 %v736_v0  ;;  %642 = vmatpush3.bf16.msra.mxu1 %v736_v0  ;;  %s587_s29 = sshll.u32 %s179_s28, 2  ;;  %v588_v8 = vld [vmem:[%s980_s2] ss:$0 sm:$0xff]  ;;  %p350_p8 = scmp.lt.s32.totalorder (%p881_p4), %s349_s12, 7 }
  0x13   : > { %624 = vmatprep.subr.bf16.mxu0 %v737_v1  ;;  %639 = vmatprep.subr.bf16.mxu1 %v737_v1  ;;  %s181_s7 = scalar_lea.vmem %s978_s0, %s587_s29  ;;  %s929_s22 = scalar_lea.vmem (%p881_p4), %s981_s3, %s613_s17  }
  0x14   : > { %v740_v4 = vld [vmem:[%s181_s7] sm:$0xff]   ;;  %v741_v5 = vld [vmem:[%s181_s7 + $0x10] sm:$0xff]   ;;  %v742_v6 = vld [vmem:[%s181_s7 + $0x8] sm:$0xff]  }
  0x15   : > { %630 = vmatprep.mubr.msk.bf16.mxu0 %vm257_vm0, %v740_v4  ;;  %634 = vmatprep.mubr.msk.bf16.mxu1 %vm257_vm0, %v741_v5  ;;  %v743_v7 = vld [vmem:[%s181_s7 + $0x18] ss:$0 sps:$4 sm:$0xff]  }
  0x16   : > { %625 = vmatpush3.bf16.msra.mxu0 %v737_v1  ;;  %643 = vmatpush3.bf16.msra.mxu1 %v737_v1 }
  0x17   : > { %626 = vmatprep.subr.bf16.mxu0 %v738_v2  ;;  %640 = vmatprep.subr.bf16.mxu1 %v738_v2 }
  0x1a   : > { %627 = vmatpush3.bf16.msra.mxu0 %v738_v2  ;;  %644 = vmatpush3.bf16.msra.mxu1 %v738_v2 }
  0x1b   : > { %628 = vmatprep.subr.bf16.mxu0 %v739_v3  ;;  %641 = vmatprep.subr.bf16.mxu1 %v739_v3 }
  0x1e   : > { %629 = vmatpush3.bf16.msra.mxu0 %v739_v3  ;;  %645 = vmatpush3.bf16.msra.mxu1 %v739_v3 }
  0x21   : > { %631 = vmatmul.mubr.msk.bf16.vlgmr.msra.gmra.mxu0 %vm257_vm0, %v742_v6  ;;  %635 = vmatmul.mubr.msk.bf16.vlgmr.msra.gmra.mxu1 %vm257_vm0, %v743_v7 }
  0xe1   : > { %v632_v9 = vpop.f32.mrf.mxu0  ;;  %v636_v10 = vpop.f32.mrf.mxu1 }
  0xe2   : > { %v313_v11 = vadd.f32 %v632_v9, %v588_v8  ;;  %v329_v12 = vadd.f32 %v636_v10, %v588_v8 }
  0xe3   : > { %v304_v13 = vpop.f32.mrf.mxu0  ;;  %v320_v14 = vpop.f32.mrf.mxu1 }
  0xe4   : > { %336 = vst [vmem:[%s913_s14 + $0x10] sm:$0xff] %v313_v11  ;;  %340 = vst [vmem:[%s913_s14 + $0x30] sm:$0xff] %v329_v12  ;;  %v305_v15 = vadd.f32 %v588_v8, %v304_v13  ;;  %v321_v16 = vadd.f32 %v588_v8, %v320_v14 }
  0xe5   : > { %v633_v17 = vpop.f32.mrf.mxu0  ;;  %v637_v18 = vpop.f32.mrf.mxu1 }
  0xe6   : > { %334 = vst [vmem:[%s913_s14] sm:$0xff] %v305_v15  ;;  %338 = vst [vmem:[%s913_s14 + $0x20] sm:$0xff] %v321_v16  ;;  %v316_v19 = vadd.f32 %v633_v17, %v588_v8  ;;  %347 = sbr.rel (!%p881_p4) target bundleno = 288 (0x120), region = 36 }
  0xe7   : > { %v307_v20 = vpop.f32.mrf.mxu0  ;;  %v323_v21 = vpop.f32.mrf.mxu1 }
  0xe8   : > { %337 = vst [vmem:[%s913_s14 + $0x18] sm:$0xff] %v316_v19  ;;  %v308_v22 = vadd.f32 %v588_v8, %v307_v20  ;;  %v324_v23 = vadd.f32 %v588_v8, %v323_v21 }
  0xea   : > { %335 = vst [vmem:[%s913_s14 + $0x8] sm:$0xff] %v308_v22  ;;  %339 = vst [vmem:[%s913_s14 + $0x28] sm:$0xff] %v324_v23 }
  0xeb   : > { %s990_s12 = smov (!%p350_p8, %s349_s12), 7 }
  0xec   : > { %s601_s24 = sshll.u32 %s990_s12, 7 }
  0xed   : > { %p604_p9 = scmp.eq.s32.totalorder %s601_s24, 0 }
  0xee   : > { %744 = sdivrem.u32 (!%p604_p9), %s990_s12, 7 }
  0xef   : > { %358 = sbr.rel (%p604_p9) target bundleno = 288 (0x120), region = 40 }
  0xf7   : > { %s935_s20 = spop.drf %744 }
  0xf8   : > { %p605_p10 = scmp.le.s32.totalorder %s935_s20, 0 }
  0xf9   : > { %s983_s15 = smov (!%p605_p10), %s929_s22  ;;  %s984_s23 = smov (!%p605_p10), %s913_s14 }
  0xfa   : > { %539 = sbr.rel (%p605_p10) target bundleno = 263 (0x107), region = 116  ;;  %s944_s25 = smov (!%p605_p10), 0  }
  0xfb   : > { %s946_s26 = smov (!%p605_p10), 0  }
  0xff LB: >> { %v435_v24 = vld [vmem:[%s810_s23] sm:$0xff]  ;;  %v437_v25 = vld [vmem:[%s810_s23 + $0x8] sm:$0xff]  ;;  %v439_v26 = vld [vmem:[%s810_s23 + $0x10] sm:$0xff]  ;;  %s449_s27 = sadd.s32 1, %s814_s25  ;;  %s429_s26 = sadd.s32 1, %s818_s26   ;;  %s818_s26 = sphi %s946_s26, %s429_s26   ;;  %s814_s25 = sphi %s944_s25, %s985_s25   ;;  %s810_s23 = sphi %s984_s23, %s454_s23   ;;  %s806_s15 = sphi %s983_s15, %s455_s15  }
 0x100   : >> { %436 = vst [vmem:[%s806_s15] sm:$0xff] %v435_v24  ;;  %438 = vst [vmem:[%s806_s15 + $0x8] sm:$0xff] %v437_v25  ;;  %v441_v27 = vld [vmem:[%s810_s23 + $0x18] sm:$0xff]  ;;  %v443_v28 = vld [vmem:[%s810_s23 + $0x20] sm:$0xff]  ;;  %p450_p11 = scmp.ge.s32.totalorder %s449_s27, %s935_s20  ;;  %p428_p12 = scmp.ge.s32.totalorder %s429_s26, %s935_s20 }
 0x101   : >> { %440 = vst [vmem:[%s806_s15 + $0x10] sm:$0xff] %v439_v26  ;;  %v445_v29 = vld [vmem:[%s810_s23 + $0x28] sm:$0xff]  ;;  %442 = vst [vmem:[%s806_s15 + $0x18] sm:$0xff] %v441_v27  ;;  %v447_v30 = vld [vmem:[%s810_s23 + $0x30] sm:$0xff] }
 0x102   : >> { %444 = vst [vmem:[%s806_s15 + $0x20] sm:$0xff] %v443_v28  ;;  %446 = vst [vmem:[%s806_s15 + $0x28] sm:$0xff] %v445_v29  ;;  %s992_s27 = smov (%p450_p11, %s449_s27), 0  ;;  %431 = sbr.rel (!%p428_p12) target bundleno = 255 (0xff), region = 122 }
 0x103   : >> { %448 = vst [vmem:[%s806_s15 + $0x30] sm:$0xff] %v447_v30  ;;  %s452_s28 = smul.u32 56, %s992_s27  ;;  %s985_s25 = smov %s992_s27 }
 0x105   : >> { %s454_s23 = scalar_lea.vmem %s913_s14, %s452_s28 [#allocation2]   ;;  %s455_s15 = scalar_lea.vmem %s929_s22, %s452_s28  }
 0x107 PF: > { %746 = sdivrem.u32 %s990_s12, 7 }
 0x108   : > { %s606_s29 = smul.u32 56, %s935_s20 }
 0x10a   : > { %s460_s30 = scalar_lea.vmem %s913_s14, %s606_s29 [#allocation2]   ;;  %s462_s4 = scalar_lea.vmem %s929_s22, %s606_s29  }
 0x110   : > { %s747_s5 = spop.drf %746 }
 0x111   : > { %p608_p13 = scmp.le.s32.totalorder %s747_s5, 0 }
 0x112   : > { %s820_s6 = smov (!%p608_p13), %s462_s4   ;;  %s824_s7 = smov (!%p608_p13), %s460_s30  }
 0x113   : > { %553 = sbr.rel (%p608_p13) target bundleno = 288 (0x120), region = 127  ;;  %s828_s8 = smov (!%p608_p13), 0  }
 0x114   : > { %s832_s9 = smov (!%p608_p13), 0  }
 0x118 LB: >> { %v472_v31 = vld [vmem:[%s826_s7] sm:$0xff]  ;;  %s474_s10 = sadd.s32 1, %s830_s8  ;;  %s466_s9 = sadd.s32 1, %s834_s9   ;;  %s834_s9 = sphi %s832_s9, %s466_s9   ;;  %s830_s8 = sphi %s828_s8, %s829_s8   ;;  %s826_s7 = sphi %s824_s7, %s479_s7   ;;  %s822_s6 = sphi %s820_s6, %s480_s6  }
 0x119   : >> { %473 = vst [vmem:[%s822_s6] sm:$0xff] %v472_v31  ;;  %p475_p0 = scmp.ge.s32.totalorder %s474_s10, %s747_s5  ;;  %p465_p1 = scmp.ge.s32.totalorder %s466_s9, %s747_s5 }
 0x11b   : >> { %s994_s10 = smov (%p475_p0, %s474_s10), 0  ;;  %468 = sbr.rel (!%p465_p1) target bundleno = 280 (0x118), region = 133 }
 0x11c   : >> { %s609_s11 = sshll.u32 %s994_s10, 3  ;;  %s829_s8 = smov %s994_s10  }
 0x11d   : >> { %s479_s7 = scalar_lea.vmem %s460_s30, %s609_s11 [#allocation2]   ;;  %s480_s6 = scalar_lea.vmem %s462_s4, %s609_s11  }
 0x120 PF: > { %p10_p2 = scmp.ge.s32.totalorder %s871_s16, 4   ;;  %s986_s12 = smov %s798_s13 }
 0x121   : > { %s987_s13 = smov %s879_s19  ;;  %s988_s14 = smov %s871_s16 }
 0x122   :  { %12 = sbr.rel (!%p10_p2) target bundleno = 2 (0x2), region = 144 }

</bundles_post_ra>
